<compile_context>
chip_gen: v7x
topology: tpu7x:2x2x1
jax: 0.10.0
libtpu: 0.0.40
codegen_flags: <defaults>
</compile_context>

<pallas_src>
import functools

import jax
import jax.numpy as jnp
from jax.experimental import pallas as pl
from jax.experimental.pallas import tpu as pltpu


def _rope_kernel(pos_ref, inv_ref, cos_ref, sin_ref, *, duplicate):
    # pos_ref : (TS, 1) int32      inv_ref : (1, W) float32
    # cos_ref / sin_ref : (TS, head_dim) in output dtype
    pos = pos_ref[...].astype(jnp.float32)        # (TS, 1)  rows on sublanes
    inv = inv_ref[...]                            # (1, W)   lanes
    # freqs[r, k] = pos[r] * inv[k] -- pure broadcast multiply on the VPU
    # (deliberately NOT routed through the MXU).  Keep f32 for the
    # transcendental argument (accuracy for large positions).
    freqs = pos * inv                             # (TS, W) f32

    c = jnp.cos(freqs).astype(cos_ref.dtype)
    s = jnp.sin(freqs).astype(sin_ref.dtype)
    if duplicate:
        # Only taken when W = head_dim/2 >= 128 (lane-dense), where half-width
        # compute genuinely halves EUP pushes; the concat rides the idle XLU.
        c = jnp.concatenate([c, c], axis=-1)
        s = jnp.concatenate([s, s], axis=-1)
    cos_ref[...] = c
    sin_ref[...] = s


def rotary_embedding(position_ids, head_dim, rope_base=10000.0,
                     dtype=jnp.bfloat16, tile_rows=2048):
    """position_ids: (B, S) int array. Returns (cos, sin), each (B, S, head_dim) in `dtype`."""
    assert head_dim % 2 == 0, "head_dim must be even for rotary embeddings"
    B, S = position_ids.shape
    half = head_dim // 2
    R = B * S

    # Round user tile_rows to a multiple of 16 (bf16 output sublane packing).
    tile_rows = max(16, (int(tile_rows) // 16) * 16)

    # inv_freq = 1 / base^(arange(0, D, 2)/D)  (wrapper glue, plain JAX)
    inv_freq = 1.0 / (rope_base ** (jnp.arange(0, head_dim, 2, dtype=jnp.float32)
                                    / head_dim))
    duplicate = half >= 128
    if duplicate:
        inv = inv_freq.reshape(1, half)                                # (1, D/2)
        W = half
    else:
        inv = jnp.concatenate([inv_freq, inv_freq]).reshape(1, head_dim)  # (1, D)
        W = head_dim

    # Flatten (B, S) -> (R, 1): rows land on the sublane axis inside the kernel.
    pos_flat = position_ids.reshape(R, 1).astype(jnp.int32)

    # Row-tile selection.
    if R <= tile_rows:
        if R >= 512:
            # Split into 2 even tiles so v7x's two TensorCores both get work.
            TS = ((pl.cdiv(R, 2) + 15) // 16) * 16
        else:
            TS = R            # single tile, block dims == full array dims
    else:
        TS = tile_rows
    num_tiles = pl.cdiv(R, TS)   # partial final block is masked on writeback

    out_itemsize = jnp.dtype(dtype).itemsize

    # Scheduling hint for XLA around this write-heavy custom call.
    cost = pl.CostEstimate(
        flops=R * W,                           # pos * inv broadcast multiply
        transcendentals=2 * R * W,             # cos + sin
        bytes_accessed=2 * R * head_dim * out_itemsize + R * 4,
    )

    # Only raise the scoped-VMEM limit when the working set would exceed the
    # v5e default (16 MiB); v6e/v7x defaults (32 MiB) already cover tile_rows=2048.
    vmem_est = (2 * 2 * TS * head_dim * out_itemsize   # cos+sin, double buffered
                + 2 * TS * 128 * 4                     # (TS,1) positions, lane-padded, x2 bufs
                + 6 * TS * max(W, 128) * 4)            # f32 intermediates headroom
    cp_kwargs = dict(dimension_semantics=("parallel",))
    if vmem_est > 14 * (1 << 20):
        cp_kwargs["vmem_limit_bytes"] = min(int(vmem_est) + (4 << 20), 64 << 20)

    grid_spec = pltpu.PrefetchScalarGridSpec(
        num_scalar_prefetch=0,
        grid=(num_tiles,),
        in_specs=[
            pl.BlockSpec((TS, 1), lambda i: (i, 0)),        # positions tile
            pl.BlockSpec((1, W), lambda i: (0, 0)),         # inv table (shared)
        ],
        out_specs=[
            pl.BlockSpec((TS, head_dim), lambda i: (i, 0)),
            pl.BlockSpec((TS, head_dim), lambda i: (i, 0)),
        ],
    )

    cos_flat, sin_flat = pl.pallas_call(
        functools.partial(_rope_kernel, duplicate=duplicate),
        out_shape=(
            jax.ShapeDtypeStruct((R, head_dim), dtype),
            jax.ShapeDtypeStruct((R, head_dim), dtype),
        ),
        grid_spec=grid_spec,
        compiler_params=pltpu.CompilerParams(**cp_kwargs),
        cost_estimate=cost,
    )(pos_flat, inv)

    cos = cos_flat.reshape(B, S, head_dim)   # free metadata reshape (no padding)
    sin = sin_flat.reshape(B, S, head_dim)
    return cos, sin


def _reference(position_ids, head_dim, rope_base=10000.0, dtype=jnp.bfloat16):
    inv_freq = 1.0 / (rope_base ** (jnp.arange(0, head_dim, 2, dtype=jnp.float32)
                                    / head_dim))
    freqs = position_ids.astype(jnp.float32)[:, :, None] * inv_freq[None, None, :]
    emb = jnp.concatenate([freqs, freqs], axis=-1)
    return jnp.cos(emb).astype(dtype), jnp.sin(emb).astype(dtype)


def _check(cos, sin, cos_ref, sin_ref, atol):
    assert cos.shape == cos_ref.shape and cos.dtype == cos_ref.dtype
    assert sin.shape == sin_ref.shape and sin.dtype == sin_ref.dtype
    assert jnp.allclose(cos.astype(jnp.float32), cos_ref.astype(jnp.float32), atol=atol)
    assert jnp.allclose(sin.astype(jnp.float32), sin_ref.astype(jnp.float32), atol=atol)


if __name__ == "__main__":
    key = jax.random.PRNGKey(0)

    # Small shape (single-tile, full-width compute path).
    B, S, head_dim = 2, 8, 32
    position_ids = jax.random.randint(key, (B, S), 0, 4096, dtype=jnp.int32)
    cos, sin = rotary_embedding(position_ids, head_dim)
    jax.block_until_ready((cos, sin))
    cos_r, sin_r = _reference(position_ids, head_dim)
    _check(cos, sin, cos_r, sin_r, atol=1e-2)

    # Multi-tile path with a partial final block (R = 3000, TS = 2048).
    B2, S2, hd2 = 3, 1000, 128
    pos2 = jax.random.randint(jax.random.PRNGKey(1), (B2, S2), 0, 32768, dtype=jnp.int32)
    cos2, sin2 = rotary_embedding(pos2, hd2)
    jax.block_until_ready((cos2, sin2))
    cos2_r, sin2_r = _reference(pos2, hd2)
    _check(cos2, sin2, cos2_r, sin2_r, atol=2e-2)

    # Lane-dense half-width + concat path (half = 128) with the even 2-way split.
    B3, S3, hd3 = 2, 300, 256
    pos3 = jax.random.randint(jax.random.PRNGKey(2), (B3, S3), 0, 32768, dtype=jnp.int32)
    cos3, sin3 = rotary_embedding(pos3, hd3)
    jax.block_until_ready((cos3, sin3))
    cos3_r, sin3_r = _reference(pos3, hd3)
    _check(cos3, sin3, cos3_r, sin3_r, atol=2e-2)

    print("KERNEL_OK")
</pallas_src>

<mosaic_0001>
module attributes {stable_mosaic.version = 11 : i64} {
  func.func @_rope_kernel(%arg0: i32, %arg1: memref<16x1xi32, #tpu.memory_space<vmem>>, %arg2: memref<1x32xf32, #tpu.memory_space<vmem>>, %arg3: memref<16x32xbf16, #tpu.memory_space<vmem>>, %arg4: memref<16x32xbf16, #tpu.memory_space<vmem>>) attributes {dimension_semantics = [#tpu.dimension_semantics<parallel>], iteration_bounds = array<i64: 1>, scalar_prefetch = 0 : i64, scratch_operands = 0 : i64, tpu.core_type = #tpu.core_type<tc>, window_params = [{transform_indices = @transform_0, window_bounds = array<i64: 16, 1>}, {pipeline_mode = #tpu.pipeline_mode<synchronous>, transform_indices = @transform_1, window_bounds = array<i64: 1, 32>}, {transform_indices = @transform_2, window_bounds = array<i64: 16, 32>}, {transform_indices = @transform_3, window_bounds = array<i64: 16, 32>}]} {
    %c0 = arith.constant 0 : index
    %c0_0 = arith.constant 0 : index
    %0 = vector.load %arg1[%c0, %c0_0] : memref<16x1xi32, #tpu.memory_space<vmem>>, vector<16x1xi32>
    %1 = arith.sitofp %0 : vector<16x1xi32> to vector<16x1xf32>
    %c0_1 = arith.constant 0 : index
    %c0_2 = arith.constant 0 : index
    %2 = vector.load %arg2[%c0_1, %c0_2] : memref<1x32xf32, #tpu.memory_space<vmem>>, vector<1x32xf32>
    %3 = vector.broadcast %1 : vector<16x1xf32> to vector<16x32xf32>
    %4 = vector.broadcast %2 : vector<1x32xf32> to vector<16x32xf32>
    %5 = arith.mulf %3, %4 : vector<16x32xf32>
    %6 = math.cos %5 : vector<16x32xf32>
    %7 = arith.truncf %6 : vector<16x32xf32> to vector<16x32xbf16>
    %8 = math.sin %5 : vector<16x32xf32>
    %9 = arith.truncf %8 : vector<16x32xf32> to vector<16x32xbf16>
    %c0_3 = arith.constant 0 : index
    %c0_4 = arith.constant 0 : index
    %10 = vector.load %arg3[%c0_3, %c0_4] : memref<16x32xbf16, #tpu.memory_space<vmem>>, vector<16x32xbf16>
    tpu.vector_store %arg3[%c0_3, %c0_4], %7 {strides = array<i32>} : memref<16x32xbf16, #tpu.memory_space<vmem>>, vector<16x32xbf16>,
    %c0_5 = arith.constant 0 : index
    %c0_6 = arith.constant 0 : index
    %11 = vector.load %arg4[%c0_5, %c0_6] : memref<16x32xbf16, #tpu.memory_space<vmem>>, vector<16x32xbf16>
    tpu.vector_store %arg4[%c0_5, %c0_6], %9 {strides = array<i32>} : memref<16x32xbf16, #tpu.memory_space<vmem>>, vector<16x32xbf16>,
    return
  }
  func.func @transform_0(%arg0: i32) -> (i32, i32) {
    %c0_i32 = arith.constant 0 : i32
    %c0_i32_0 = arith.constant 0 : i32
    return %arg0, %c0_i32 : i32, i32
  }
  func.func @transform_1(%arg0: i32) -> (i32, i32) {
    %c0_i32 = arith.constant 0 : i32
    %c0_i32_0 = arith.constant 0 : i32
    %c0_i32_1 = arith.constant 0 : i32
    return %c0_i32, %c0_i32_0 : i32, i32
  }
  func.func @transform_2(%arg0: i32) -> (i32, i32) {
    %c0_i32 = arith.constant 0 : i32
    %c0_i32_0 = arith.constant 0 : i32
    return %arg0, %c0_i32 : i32, i32
  }
  func.func @transform_3(%arg0: i32) -> (i32, i32) {
    %c0_i32 = arith.constant 0 : i32
    %c0_i32_0 = arith.constant 0 : i32
    return %arg0, %c0_i32 : i32, i32
  }
}

</mosaic_0001>

<bundles_post_ra>
// kernel: tpu_custom_call.1
= control target key start
LH: loop header
LB: loop body
LE: loop exit
PB: predicated region body
PF: predicated region fallthrough
CT: control target
= control target key end

     0   :  { %9 = vsyncpa [#allocation3], 0  ;;  %v606_v2 = vmov 0   ;;  %s741_s0 = inlined_call_operand.vmem [shape: s32[16,1], index: 0, kind: input, shape index: {}]   ;;  %s742_s1 = inlined_call_operand.vmem [shape: f32[1,32], index: 1, kind: input, shape index: {}]   ;;  %s743_s2 = inlined_call_operand.hbm [shape: bf16[16,32], index: 2, kind: output, shape index: {0}]   ;;  %s744_s3 = inlined_call_operand.hbm [shape: bf16[16,32], index: 3, kind: output, shape index: {1}]  }
   0x1   :  { %v15_v0 = vld [vmem:[%s741_s0] sm:$0xff]  ;;  %v16_v1 = vld [vmem:[%s741_s0 + $0x8] sm:$0xff]  ;;  %549 = vset.pattern.permute.xlu0 %v606_v2 }
   0x2   :  { %v17_v3 = vcvt.s32.f32 %v15_v0 }
   0x3   :  { %10 = vsyncpa [#allocation5], 0  ;;  %v18_v4 = vcvt.s32.f32 %v16_v1  ;;  %v505_v5 = vld [vmem:[%s742_s1] ss:$0 sm:$0xff]  ;;  %v607_v26 = vmov 683565275  }
   0x4   :  { %22 = vperm.xlu0 %549, %v17_v3   ;;  %v608_v30 = vmov 2475754826   ;;  %v609_v32 = vmov 2131351028   ;;  %v610_v34 = vmov 2102212464  }
   0x5   :  { %v611_v36 = vmov 920167782   ;;  %v612_v43 = vmov 1326507024   ;;  %s613_s0 = smov [#allocation2]   ;;  %s614_s18 = smov [#allocation4]  }
   0x6   :  { %s478_s1 = sshll.u32 %s613_s0, 4  ;;  %s490_s19 = sshll.u32 %s614_s18, 4  ;;  %s479_s1 = int_to_ptr.vmem [resolvable:$true] %s478_s1  ;;  %s708_s19 = int_to_ptr.vmem [resolvable:$true] %s490_s19 }
   0x7   :  { %s558_s20 = scalar_lea.vmem %s479_s1, 128  ;;  %p563_p1 = scmp.lt.s32.totalorder %s479_s1, %s479_s1 }
   0x8   :  { %27 = vperm.xlu0 %549, %v18_v4   ;;  %p559_p0 = scmp.ne.s32.totalorder %s479_s1, %s558_s20  ;;  %p564_p2 = scmp.lt.s32.totalorder %s558_s20, %s558_s20 }
   0xa   :  { %p565_p3 = por %p564_p2, %p563_p1 }
   0xc   :  { %p566_p4 = pnand %p565_p3, %p559_p0 }
  0x83   :  { %v23_v6 = vpop.permute.xlu0 %22 }
  0x84   :  { %v646_v7 = vmul.f32 %v505_v5, %v23_v6 }
  0x86   :  { %v38_v8 = vand.u32 2147483647, %v646_v7  ;;  %v41_v9 = vand.u32 2139095040, %v646_v7  ;;  %vm40_vm14 = vcmp.lt.s32.totalorder %v646_v7, 0 }
  0x87   :  { %v28_v10 = vpop.permute.xlu0 %27 }
  0x88   :  { %v42_v11 = vshrl.u32 %v41_v9, 23  ;;  %v650_v12 = vmul.f32 %v505_v5, %v28_v10  ;;  %v45_v13 = vand.u32 8388607, %v38_v8  ;;  %vm39_vm15 = vcmp.le.f32.partialorder %v38_v8, 0.7853982 }
  0x8a   :  { %v506_v14 = vadd.s32 4294967169, %v42_v11  ;;  %v144_v15 = vand.u32 2139095040, %v650_v12  ;;  %v46_v17 = vor.u32 8388608, %v45_v13  ;;  %v141_v19 = vand.u32 2147483647, %v650_v12 }
  0x8c   :  { %v48_v16 = vadd.s32 1, %v506_v14  ;;  %v145_v18 = vshrl.u32 %v144_v15, 23  ;;  %v656_v24 = vshll.u32 %v46_v17, 8  ;;  %v148_v28 = vand.u32 8388607, %v141_v19 }
  0x8e   :  { %vm49_vm0 = vcmp.gt.s32.totalorder %v48_v16, 0  ;;  %v510_v21 = vadd.s32 4294967169, %v145_v18  ;;  %v149_v58 = vor.u32 8388608, %v148_v28 }
  0x8f   :  { %v50_v20 = vsel %vm49_vm0, %v48_v16, 0  ;;  %vm143_vm0 = vcmp.lt.s32.totalorder %v650_v12, 0 }
  0x90   :  { %v51_v22 = vshrl.u32 %v50_v20, 5  ;;  %v52_v23 = vand.u32 31, %v50_v20  ;;  %v151_v29 = vadd.s32 1, %v510_v21  ;;  %v189_v9 = vshll.u32 %v149_v58, 8 }
  0x92   :  { %v53_v25 = vsub.s32 32, %v52_v23  ;;  %v55_v27 = vshll.u32 %v607_v26, %v52_v23  ;;  %v58_v31 = vshll.u32 %v608_v30, %v52_v23  ;;  %v61_v33 = vshll.u32 %v609_v32, %v52_v23 }
  0x93   :  { %v64_v35 = vshll.u32 %v610_v34, %v52_v23  ;;  %v67_v37 = vshll.u32 %v611_v36, %v52_v23  ;;  %vm70_vm1 = vcmp.lt.s32.totalorder %v51_v22, 1  ;;  %vm72_vm2 = vcmp.lt.s32.totalorder %v51_v22, 3 }
  0x94   :  { %v56_v38 = vshrl.u32 %v608_v30, %v53_v25  ;;  %v59_v39 = vshrl.u32 %v609_v32, %v53_v25  ;;  %v62_v40 = vshrl.u32 %v610_v34, %v53_v25  ;;  %v54_v41 = vshrl.u32 %v607_v26, %v53_v25 }
  0x95   :  { %v65_v42 = vshrl.u32 %v611_v36, %v53_v25  ;;  %v68_v44 = vshrl.u32 %v612_v43, %v53_v25  ;;  %vm152_vm3 = vcmp.gt.s32.totalorder %v151_v29, 0  ;;  %vm73_vm4 = vcmp.lt.s32.totalorder %v51_v22, 4 }
  0x96   :  { %v57_v45 = vor.u32 %v56_v38, %v55_v27  ;;  %v60_v46 = vor.u32 %v59_v39, %v58_v31  ;;  %v63_v47 = vor.u32 %v62_v40, %v61_v33  ;;  %v153_v50 = vsel %vm152_vm3, %v151_v29, 0 }
  0x97   :  { %v66_v48 = vor.u32 %v65_v42, %v64_v35  ;;  %v69_v49 = vor.u32 %v68_v44, %v67_v37  ;;  %vm71_vm5 = vcmp.lt.s32.totalorder %v51_v22, 2  ;;  %v155_v61 = vand.u32 31, %v153_v50 }
  0x98   :  { %v74_v51 = vsel %vm70_vm1, %v54_v41, %v57_v45  ;;  %v75_v52 = vsel %vm73_vm4, %v63_v47, 2102212464  ;;  %v78_v53 = vsel %vm70_vm1, %v57_v45, %v60_v46  ;;  %v82_v54 = vsel %vm70_vm1, %v60_v46, %v63_v47 }
  0x99   :  { %v76_v55 = vsel %vm72_vm2, %v60_v46, %v75_v52  ;;  %v79_v56 = vsel %vm73_vm4, %v66_v48, 920167782  ;;  %v83_v57 = vsel %vm73_vm4, %v69_v49, 1326507024  ;;  %v154_v5 = vshrl.u32 %v153_v50, 5 }
  0x9a   :  { %v80_v59 = vsel %vm72_vm2, %v63_v47, %v79_v56  ;;  %v84_v60 = vsel %vm72_vm2, %v66_v48, %v83_v57  ;;  %v77_v62 = vsel %vm71_vm5, %v74_v51, %v76_v55  ;;  %v156_v6 = vsub.s32 32, %v155_v61 }
  0x9b   :  { %v81_v63 = vsel %vm71_vm5, %v78_v53, %v80_v59  ;;  %v85_v0 = vsel %vm71_vm5, %v82_v54, %v84_v60  ;;  %v93_v10 = vmul.u32 %v656_v24, %v77_v62  ;;  %v158_v11 = vshll.u32 %v607_v26, %v155_v61 }
  0x9c   :  { %v669_v1 = vmul.u32.u64.low %v656_v24, %v85_v0  ;;  %v670_v2 = vmul.u32.u64.high %v656_v24, %v85_v0, %v669_v1  ;;  %v673_v3 = vmul.u32.u64.low %v656_v24, %v81_v63  ;;  %v674_v4 = vmul.u32.u64.high %v656_v24, %v81_v63, %v673_v3 }
  0x9d   :  { %v161_v13 = vshll.u32 %v608_v30, %v155_v61  ;;  %v164_v14 = vshll.u32 %v609_v32, %v155_v61  ;;  %v159_v15 = vshrl.u32 %v608_v30, %v156_v6  ;;  %v162_v16 = vshrl.u32 %v609_v32, %v156_v6 }
  0x9e   :  { %v165_v17 = vshrl.u32 %v610_v34, %v156_v6  ;;  %v167_v18 = vshll.u32 %v610_v34, %v155_v61  ;;  %vm95_vm6 = vc.u32 %v670_v2, %v673_v3  ;;  %v96_v20 = vadd.s32 1, %v674_v4 }
  0x9f   :  { %v168_v21 = vshrl.u32 %v611_v36, %v156_v6  ;;  %v170_v22 = vshll.u32 %v611_v36, %v155_v61  ;;  %v160_v23 = vor.u32 %v159_v15, %v158_v11  ;;  %v163_v25 = vor.u32 %v162_v16, %v161_v13 }
  0xa0   :  { %v166_v27 = vor.u32 %v165_v17, %v164_v14  ;;  %v171_v28 = vshrl.u32 %v612_v43, %v156_v6  ;;  %v97_v24 = vsel %vm95_vm6, %v96_v20, %v674_v4  ;;  %vm173_vm7 = vcmp.lt.s32.totalorder %v154_v5, 1 }
  0xa1   :  { %v169_v29 = vor.u32 %v168_v21, %v167_v18  ;;  %vm176_vm8 = vcmp.lt.s32.totalorder %v154_v5, 4  ;;  %v98_v30 = vadd.s32 %v97_v24, %v93_v10  ;;  %vm175_vm9 = vcmp.lt.s32.totalorder %v154_v5, 3 }
  0xa2   :  { %v172_v31 = vor.u32 %v171_v28, %v170_v22  ;;  %v178_v32 = vsel %vm176_vm8, %v166_v27, 2102212464  ;;  %v157_v33 = vshrl.u32 %v607_v26, %v156_v6  ;;  %v181_v34 = vsel %vm173_vm7, %v160_v23, %v163_v25 }
  0xa3   :  { %v182_v35 = vsel %vm176_vm8, %v169_v29, 920167782  ;;  %v185_v37 = vsel %vm173_vm7, %v163_v25, %v166_v27  ;;  %v99_v38 = vadd.s32 536870912, %v98_v30  ;;  %vm174_vm10 = vcmp.lt.s32.totalorder %v154_v5, 2 }
  0xa4   :  { %v183_v36 = vsel %vm175_vm9, %v166_v27, %v182_v35  ;;  %v186_v39 = vsel %vm176_vm8, %v172_v31, 1326507024  ;;  %v177_v40 = vsel %vm173_vm7, %v157_v33, %v160_v23  ;;  %v179_v41 = vsel %vm175_vm9, %v163_v25, %v178_v32 }
  0xa5   :  { %v184_v42 = vsel %vm174_vm10, %v181_v34, %v183_v36  ;;  %v187_v43 = vsel %vm175_vm9, %v169_v29, %v186_v39  ;;  %v100_v44 = vshrl.u32 %v99_v38, 30  ;;  %v180_v50 = vsel %vm174_vm10, %v177_v40, %v179_v41 }
  0xa6   :  { %v188_v45 = vsel %vm174_vm10, %v185_v37, %v187_v43  ;;  %v684_v46 = vmul.u32.u64.low %v189_v9, %v184_v42  ;;  %v685_v47 = vmul.u32.u64.high %v189_v9, %v184_v42, %v684_v46  ;;  %v196_v53 = vmul.u32 %v189_v9, %v180_v50 }
  0xa7   :  { %v687_v48 = vmul.u32.u64.low %v189_v9, %v188_v45  ;;  %v688_v49 = vmul.u32.u64.high %v189_v9, %v188_v45, %v687_v48  ;;  %v101_v26 = vshll.u32 %v100_v44, 30  ;;  %v94_v1 = vadd.s32 %v673_v3, %v670_v2 }
  0xa8   :  { %v199_v52 = vadd.s32 1, %v685_v47  ;;  %v124_v23 = vsub.s32 4, %v100_v44  ;;  %vm142_vm1 = vcmp.le.f32.partialorder %v141_v19, 0.7853982  ;;  %vm130_vm8 = vweird.f32 %v646_v7 }
  0xa9   :  { %v102_v51 = vsub.s32 %v98_v30, %v101_v26  ;;  %vm198_vm11 = vc.u32 %v688_v49, %v684_v46  ;;  %v197_v2 = vadd.s32 %v684_v46, %v688_v49  ;;  %vm461_vm9 = vcmask 257024  }
  0xaa   :  { %v200_v55 = vsel %vm198_vm11, %v199_v52, %v685_v47  ;;  %v125_v32 = vsel %vm40_vm14, %v124_v23, %v100_v44 }
  0xab   :  { %v104_v54 = vsub.s32 0, %v102_v51  ;;  %v201_v56 = vadd.s32 %v200_v55, %v196_v53  ;;  %v127_v37 = vsel %vm39_vm15, 0, %v125_v32 }
  0xac   :  { %v338_v40 = vadd.s32 3, %v127_v37  ;;  %v131_v45 = vand.u32 3, %v127_v37 }
  0xad   :  { %v507_v57 = vmin.u32 %v104_v54, %v102_v51  ;;  %v202_v58 = vadd.s32 536870912, %v201_v56 }
  0xae   :  { %v339_v46 = vand.u32 3, %v338_v40  ;;  %vm136_vm2 = vcmp.eq.s32.totalorder %v131_v45, 2  ;;  %vm133_vm4 = vcmp.eq.s32.totalorder %v131_v45, 0  ;;  %vm132_vm6 = vcmp.lt.s32.totalorder %v131_v45, 2 }
  0xaf   :  { %v106_v59 = vclz %v507_v57  ;;  %v203_v60 = vshrl.u32 %v202_v58, 30 }
  0xb0   :  { %vm344_vm3 = vcmp.eq.s32.totalorder %v339_v46, 2  ;;  %vm341_vm5 = vcmp.eq.s32.totalorder %v339_v46, 0  ;;  %vm340_vm7 = vcmp.lt.s32.totalorder %v339_v46, 2 }
  0xb1   :  { %v508_v61 = vadd.s32 4294967294, %v106_v59  ;;  %v204_v62 = vshll.u32 %v203_v60, 30  ;;  %v227_v42 = vsub.s32 4, %v203_v60 }
  0xb3   :  { %vm509_vm12 = vcmp.lt.s32.totalorder %v508_v61, 0  ;;  %v205_v0 = vsub.s32 %v201_v56, %v204_v62  ;;  %v228_v44 = vsel %vm143_vm0, %v227_v42, %v203_v60 }
  0xb4   :  { %v109_v63 = vsel %vm509_vm12, 0, %v508_v61  ;;  %v230_v50 = vsel %vm142_vm1, 0, %v228_v44 }
  0xb5   :  { %v110_v4 = vsub.s32 32, %v109_v63  ;;  %v114_v5 = vsub.s32 4294967266, %v109_v63  ;;  %v207_v6 = vsub.s32 0, %v205_v0  ;;  %v111_v9 = vshll.u32 %v102_v51, %v109_v63 }
  0xb6   :  { %v442_v55 = vadd.s32 3, %v230_v50  ;;  %v234_v63 = vand.u32 3, %v230_v50 }
  0xb7   :  { %v112_v10 = vshrl.u32 %v94_v1, %v110_v4  ;;  %v115_v11 = vadd.s32 127, %v114_v5  ;;  %v511_v13 = vmin.u32 %v207_v6, %v205_v0 }
  0xb8   :  { %v443_v62 = vand.u32 3, %v442_v55  ;;  %vm239_vm10 = vcmp.eq.s32.totalorder %v234_v63, 2  ;;  %vm236_vm12 = vcmp.eq.s32.totalorder %v234_v63, 0 }
  0xb9   :  { %v113_v14 = vor.u32 %v112_v10, %v111_v9  ;;  %v116_v15 = vshll.u32 %v115_v11, 23  ;;  %v209_v16 = vclz %v511_v13 }
  0xba   :  { %vm448_vm11 = vcmp.eq.s32.totalorder %v443_v62, 2 }
  0xbb   :  { %v117_v17 = vor.u32 4788187, %v116_v15  ;;  %v512_v18 = vadd.s32 4294967294, %v209_v16  ;;  %v120_v21 = vcvt.s32.f32 %v113_v14 }
  0xbd   :  { %v118_v20 = vand.u32 2147483647, %v117_v17  ;;  %vm513_vm13 = vcmp.lt.s32.totalorder %v512_v18, 0 }
  0xbe   :  { %v212_v25 = vsel %vm513_vm13, 0, %v512_v18  ;;  %vm445_vm13 = vcmp.eq.s32.totalorder %v443_v62, 0 }
  0xbf   :  { %v121_v22 = vmul.f32 %v120_v21, %v118_v20  ;;  %v213_v3 = vsub.s32 32, %v212_v25  ;;  %v217_v27 = vsub.s32 4294967266, %v212_v25  ;;  %v214_v24 = vshll.u32 %v205_v0, %v212_v25 }
  0xc1   :  { %v122_v28 = vxor.u32 2147483648, %v121_v22  ;;  %v215_v29 = vshrl.u32 %v197_v2, %v213_v3  ;;  %v218_v30 = vadd.s32 127, %v217_v27 }
  0xc3   :  { %v123_v31 = vsel %vm40_vm14, %v122_v28, %v121_v22  ;;  %v216_v34 = vor.u32 %v215_v29, %v214_v24  ;;  %v219_v35 = vshll.u32 %v218_v30, 23  ;;  %vm235_vm14 = vcmp.lt.s32.totalorder %v234_v63, 2 }
  0xc4   :  { %v126_v33 = vsel %vm39_vm15, %v646_v7, %v123_v31  ;;  %vm444_vm15 = vcmp.lt.s32.totalorder %v443_v62, 2 }
  0xc5   :  { %550 = vcosq.f32 %v126_v33  ;;  %v220_v38 = vor.u32 4788187, %v219_v35  ;;  %v223_v39 = vcvt.s32.f32 %v216_v34 }
  0xc6   :  { %552 = vsinq.f32 %v126_v33 }
  0xc7   :  { %v221_v36 = vand.u32 2147483647, %v220_v38 }
  0xc9   :  { %v224_v41 = vmul.f32 %v223_v39, %v221_v36 }
  0xcb   :  { %v225_v43 = vxor.u32 2147483648, %v224_v41 }
  0xcd   :  { %v226_v8 = vsel %vm143_vm0, %v225_v43, %v224_v41  ;;  %vm233_vm0 = vweird.f32 %v650_v12 }
  0xce   :  { %v229_v48 = vsel %vm142_vm1, %v650_v12, %v226_v8 }
  0xcf   :  { %v551_v47 = vpop.eup %550  ;;  %554 = vcosq.f32 %v229_v48 }
  0xd0   :  { %v553_v49 = vpop.eup %552  ;;  %v137_v26 = vxor.u32 2147483648, %v551_v47  ;;  %556 = vsinq.f32 %v229_v48 }
  0xd1   :  { %v134_v51 = vxor.u32 2147483648, %v553_v49 }
  0xd2   :  { %v138_v52 = vsel %vm136_vm2, %v137_v26, %v553_v49  ;;  %v346_v53 = vsel %vm344_vm3, %v137_v26, %v553_v49 }
  0xd3   :  { %v135_v54 = vsel %vm133_vm4, %v551_v47, %v134_v51  ;;  %v343_v19 = vsel %vm341_vm5, %v551_v47, %v134_v51 }
  0xd4   :  { %v139_v56 = vsel %vm132_vm6, %v135_v54, %v138_v52  ;;  %v347_v57 = vsel %vm340_vm7, %v343_v19, %v346_v53 }
  0xd5   :  { %v140_v58 = vsel %vm130_vm8, nan, %v139_v56  ;;  %v348_v59 = vsel %vm130_vm8, nan, %v347_v57 }
  0xd6   :  { %v526_v60 = vpack.c.bf16 %v140_v58, %v140_v58  ;;  %v528_v61 = vpack.c.bf16 %v348_v59, %v348_v59 }
  0xd8   :  { %462 = vst.msk [vmem:[#allocation2] sm:$0xf] %vm461_vm9, %v526_v60  ;;  %471 = vst.msk [vmem:[#allocation4] sm:$0xf] %vm461_vm9, %v528_v61 }
  0xd9   :  { %v555_v0 = vpop.eup %554 }
  0xda   :  { %v557_v1 = vpop.eup %556  ;;  %v240_v4 = vxor.u32 2147483648, %v555_v0 }
  0xdb   :  { %v237_v5 = vxor.u32 2147483648, %v557_v1 }
  0xdc   :  { %v241_v7 = vsel %vm239_vm10, %v240_v4, %v557_v1  ;;  %v450_v6 = vsel %vm448_vm11, %v240_v4, %v557_v1 }
  0xdd   :  { %v238_v9 = vsel %vm236_vm12, %v555_v0, %v237_v5  ;;  %v447_v10 = vsel %vm445_vm13, %v555_v0, %v237_v5 }
  0xde   :  { %v242_v11 = vsel %vm235_vm14, %v238_v9, %v241_v7  ;;  %v451_v13 = vsel %vm444_vm15, %v447_v10, %v450_v6 }
  0xdf   :  { %v243_v14 = vsel %vm233_vm0, nan, %v242_v11  ;;  %v452_v15 = vsel %vm233_vm0, nan, %v451_v13 }
  0xe0   :  { %v527_v16 = vpack.c.bf16 %v243_v14, %v243_v14  ;;  %v529_v17 = vpack.c.bf16 %v452_v15, %v452_v15 }
  0xe2   :  { %463 = vst.msk [vmem:[#allocation2 + $0x4] sm:$0xf] %vm461_vm9, %v527_v16  ;;  %472 = vst.msk [vmem:[#allocation4 + $0x4] sm:$0xf] %vm461_vm9, %v529_v17 }
  0xe3   :  { %569 = shalt.err (!%p566_p4)
}
  0xe4   :  { %s570_s23 = scalar_lea.hbm %s743_s2, 128 }
  0xe5   :  { %p571_p5 = scmp.ne.s32.totalorder %s743_s2, %s570_s23  ;;  %p574_p6 = scmp.lt.u32.totalorder %s570_s23, %s743_s2 }
  0xe7   :  { %p576_p7 = pnand %p574_p6, %p571_p5 }
  0xe9   :  { %579 = shalt.err (!%p576_p7)
}
  0xea   :  { %s615_s28 = smov 64   ;;  %s616_s29 = smov 4  }
  0xeb   :  { %484 = dma.vmem_to_hbm [thread:$0]  %s479_s1, 128, %s743_s2, [#allocation3], %s615_s28, %s615_s28, %s616_s29  }
  0xec   :  { %s580_s5 = scalar_lea.vmem %s708_s19, 128  ;;  %p585_p9 = scmp.lt.s32.totalorder %s708_s19, %s708_s19 }
  0xed   :  { %p581_p8 = scmp.ne.s32.totalorder %s708_s19, %s580_s5  ;;  %p586_p10 = scmp.lt.s32.totalorder %s580_s5, %s580_s5 }
  0xef   :  { %p587_p11 = por %p586_p10, %p585_p9 }
  0xf1   :  { %p588_p12 = pnand %p587_p11, %p581_p8 }
  0xf3   :  { %591 = shalt.err (!%p588_p12)
}
  0xf4   :  { %s592_s8 = scalar_lea.hbm %s744_s3, 128 }
  0xf5   :  { %p593_p13 = scmp.ne.s32.totalorder %s744_s3, %s592_s8  ;;  %p596_p0 = scmp.lt.u32.totalorder %s592_s8, %s744_s3 }
  0xf7   :  { %p598_p1 = pnand %p596_p0, %p593_p13 }
  0xf9   :  { %601 = shalt.err (!%p598_p1)
}
  0xfa   :  { %496 = dma.vmem_to_hbm [thread:$0]  %s708_s19, 128, %s744_s3, [#allocation5], %s615_s28, %s615_s28, %s616_s29  }
  0xfb   :  { %602 = dma.done.wait [#allocation3], 128  }
  0xfc   :  { %603 = vsyncadd [#allocation3], 4294967168 }
  0xfd   :  { %604 = dma.done.wait [#allocation5], 128  }
  0xfe   :  { %605 = vsyncadd [#allocation5], 4294967168 }
  0xff   :  { %503 = vsyncpa [#allocation3], 1 }
 0x100   :  { %504 = vsyncpa [#allocation5], 1 }

</bundles_post_ra>
